<compile_context>
chip_gen: v7x
topology: tpu7x:2x2x1
jax: 0.10.0
libtpu: 0.0.40
codegen_flags: <defaults>
</compile_context>

<pallas_src>
import math
import jax
import jax.numpy as jnp
from jax.experimental import pallas as pl
from jax.experimental.pallas import tpu as pltpu

_LANE = 128


def _round_up(x, m):
    return ((x + m - 1) // m) * m


def _matmul_bias_relu_kernel(x_ref, w_ref, b_ref, o_ref, acc_ref):
    # x_ref:   (1, TM, TK)        im2col rows for this (batch, M-tile, K-tile)
    # w_ref:   (TK, COUT_PAD)     K-slice of the folded 3x3 weights (resident)
    # b_ref:   (1, COUT_PAD)      bias, zero-padded channels (resident)
    # o_ref:   (1, TM, COUT_PAD)  lane-dense output tile (last dim % 128 == 0)
    # acc_ref: (TM, COUT_PAD)     f32 VMEM accumulator, resident across K axis
    @pl.when(pl.program_id(2) == 0)
    def _init():
        acc_ref[...] = jnp.zeros_like(acc_ref)

    # Single fat MXU contraction per grid step (K folds all 9 conv taps).
    acc_ref[...] += jnp.dot(
        x_ref[0], w_ref[...], preferred_element_type=jnp.float32
    )

    @pl.when(pl.program_id(2) == pl.num_programs(2) - 1)
    def _finalize():
        out = jnp.maximum(acc_ref[...] + b_ref[...], 0.0)   # bias + ReLU in f32
        o_ref[0] = out.astype(o_ref.dtype)


def basic_block_forward(x_nchw, weight_oihw, bias):
    """Conv2d(in, out, k=3, s=1, p=1) + ReLU, matching nn.Conv2d semantics."""
    N, Cin, H, W = x_nchw.shape
    Cout = weight_oihw.shape[0]

    # --- tiling parameters ---------------------------------------------------
    COUT_PAD = _round_up(Cout, _LANE)          # lane-dense output channels
    K = 9 * Cin                                # folded 3x3 taps into contraction
    K_PAD = _round_up(K, _LANE)                # lane-dense contraction dim
    TK = _LANE                                 # one 128-deep K slice per step
    M = H * W
    TM = 512 if M >= 4096 else 128             # spatial tile (rows of im2col)
    M_PAD = _round_up(M, TM)

    # --- layout plumbing (one-time, HBM side) --------------------------------
    # TODO(synk): in a full RIDNet the NCHW<->NHWC conversion (and the im2col)
    # would be hoisted/fused at the network boundary rather than per BasicBlock.
    # TODO(synk): optionally cast x_col / w2d to bf16 on v6e/v7x (keep the f32
    # accumulator); kept f32 here to preserve the strict reference tolerance.
    x_nhwc = jnp.transpose(x_nchw, (0, 2, 3, 1))                  # (N,H,W,Cin)
    x_pad = jnp.pad(x_nhwc, ((0, 0), (1, 1), (1, 1), (0, 0)))     # (N,H+2,W+2,Cin)

    # im2col: 9 shifted views concatenated along channels, tap order (kh,kw,ci).
    taps = [x_pad[:, kh:kh + H, kw:kw + W, :]
            for kh in range(3) for kw in range(3)]
    x_col = jnp.concatenate(taps, axis=-1).reshape(N, M, K)       # (N, H*W, 9*Cin)
    x_col = jnp.pad(x_col, ((0, 0), (0, M_PAD - M), (0, K_PAD - K)))

    # Weights folded to (9*Cin, Cout) with matching (kh, kw, ci) row order.
    w_hwio = jnp.transpose(weight_oihw, (2, 3, 1, 0))             # (3,3,Cin,Cout)
    w2d = w_hwio.reshape(K, Cout)
    w2d = jnp.pad(w2d, ((0, K_PAD - K), (0, COUT_PAD - Cout)))    # (K_PAD, COUT_PAD)
    b2d = jnp.pad(bias.reshape(1, Cout), ((0, 0), (0, COUT_PAD - Cout)))

    grid = (N, M_PAD // TM, K_PAD // TK)

    flops = 2 * N * M_PAD * K_PAD * COUT_PAD
    bytes_accessed = 4 * (N * M_PAD * K_PAD          # x_col
                          + K_PAD * COUT_PAD         # weights
                          + COUT_PAD                 # bias
                          + N * M_PAD * COUT_PAD)    # output

    out_col = pl.pallas_call(
        _matmul_bias_relu_kernel,
        out_shape=jax.ShapeDtypeStruct((N, M_PAD, COUT_PAD), x_nchw.dtype),
        grid_spec=pltpu.PrefetchScalarGridSpec(
            num_scalar_prefetch=0,
            grid=grid,
            in_specs=[
                pl.BlockSpec((1, TM, TK), lambda n, m, k: (n, m, k)),
                pl.BlockSpec((TK, COUT_PAD), lambda n, m, k: (k, 0)),
                pl.BlockSpec((1, COUT_PAD), lambda n, m, k: (0, 0)),
            ],
            out_specs=pl.BlockSpec((1, TM, COUT_PAD), lambda n, m, k: (n, m, 0)),
            scratch_shapes=[pltpu.VMEM((TM, COUT_PAD), jnp.float32)],
        ),
        compiler_params=pltpu.CompilerParams(
            dimension_semantics=("parallel", "parallel", "arbitrary"),
            vmem_limit_bytes=32 * 1024 * 1024,
        ),
        cost_estimate=pl.CostEstimate(
            flops=flops, transcendentals=0, bytes_accessed=bytes_accessed),
    )(x_col, w2d, b2d)

    # Strip padding, back to NCHW to match the PyTorch module's convention.
    out_nhwc = out_col[:, :M, :Cout].reshape(N, H, W, Cout)
    return jnp.transpose(out_nhwc, (0, 3, 1, 2))


def init_conv_params(key, in_channels, out_channels, ksize=3):
    """Deterministic init mimicking nn.Conv2d defaults (kaiming uniform)."""
    kw_key, kb_key = jax.random.split(key)
    fan_in = in_channels * ksize * ksize
    bound_w = math.sqrt(6.0 / ((1 + 5.0) * fan_in))  # kaiming_uniform(a=sqrt(5))
    weight = jax.random.uniform(
        kw_key, (out_channels, in_channels, ksize, ksize),
        minval=-bound_w, maxval=bound_w, dtype=jnp.float32)
    bound_b = 1.0 / math.sqrt(fan_in)
    bias = jax.random.uniform(
        kb_key, (out_channels,), minval=-bound_b, maxval=bound_b,
        dtype=jnp.float32)
    return weight, bias


if __name__ == "__main__":
    key = jax.random.PRNGKey(0)
    kx, kp = jax.random.split(key)

    N, Cin, Cout, H, W = 2, 4, 8, 16, 16
    x = jax.random.normal(kx, (N, Cin, H, W), dtype=jnp.float32)
    weight, bias = init_conv_params(kp, Cin, Cout, ksize=3)

    out = basic_block_forward(x, weight, bias)
    out = jax.block_until_ready(out)

    # Reference check against XLA conv (same semantics as nn.Conv2d + ReLU).
    ref = jax.lax.conv_general_dilated(
        x, weight, window_strides=(1, 1), padding=((1, 1), (1, 1)),
        dimension_numbers=("NCHW", "OIHW", "NCHW"))
    ref = jnp.maximum(ref + bias[None, :, None, None], 0.0)
    assert out.shape == (N, Cout, H, W)
    assert jnp.allclose(out, ref, atol=1e-4, rtol=1e-4)

    print("KERNEL_OK")
</pallas_src>

<mosaic_0001>
module attributes {stable_mosaic.version = 11 : i64} {
  func.func @_matmul_bias_relu_kernel(%arg0: i32, %arg1: i32, %arg2: i32, %arg3: memref<1x128x128xf32, #tpu.memory_space<vmem>>, %arg4: memref<128x128xf32, #tpu.memory_space<vmem>>, %arg5: memref<1x128xf32, #tpu.memory_space<vmem>>, %arg6: memref<1x128x128xf32, #tpu.memory_space<vmem>>, %arg7: memref<128x128xf32, #tpu.memory_space<vmem>>) attributes {dimension_semantics = [#tpu.dimension_semantics<parallel>, #tpu.dimension_semantics<parallel>, #tpu.dimension_semantics<arbitrary>], iteration_bounds = array<i64: 2, 2, 1>, scalar_prefetch = 0 : i64, scratch_operands = 1 : i64, tpu.core_type = #tpu.core_type<tc>, window_params = [{transform_indices = @transform_0, window_bounds = array<i64: 1, 128, 128>}, {transform_indices = @transform_1, window_bounds = array<i64: 128, 128>}, {pipeline_mode = #tpu.pipeline_mode<synchronous>, transform_indices = @transform_2, window_bounds = array<i64: 1, 128>}, {transform_indices = @transform_3, window_bounds = array<i64: 1, 128, 128>}]} {
    %c0_i32 = arith.constant 0 : i32
    %0 = arith.cmpi eq, %arg2, %c0_i32 : i32
    %1 = arith.extui %0 : i1 to i32
    %c0_i32_0 = arith.constant 0 : i32
    %2 = arith.cmpi ne, %1, %c0_i32_0 : i32
    scf.if %2 {
      %cst_11 = arith.constant 0.000000e+00 : f32
      %13 = vector.broadcast %cst_11 : f32 to vector<128x128xf32>
      %c0_12 = arith.constant 0 : index
      %c0_13 = arith.constant 0 : index
      %14 = vector.load %arg7[%c0_12, %c0_13] : memref<128x128xf32, #tpu.memory_space<vmem>>, vector<128x128xf32>
      tpu.vector_store %arg7[%c0_12, %c0_13], %13 {strides = array<i32>} : memref<128x128xf32, #tpu.memory_space<vmem>>, vector<128x128xf32>,
    } else {
    }
    %c0 = arith.constant 0 : index
    %c0_1 = arith.constant 0 : index
    %3 = vector.load %arg7[%c0, %c0_1] : memref<128x128xf32, #tpu.memory_space<vmem>>, vector<128x128xf32>
    %c0_2 = arith.constant 0 : index
    %c0_3 = arith.constant 0 : index
    %c0_4 = arith.constant 0 : index
    %4 = vector.load %arg3[%c0_2, %c0_3, %c0_4] : memref<1x128x128xf32, #tpu.memory_space<vmem>>, vector<1x128x128xf32>
    %5 = vector.shape_cast %4 : vector<1x128x128xf32> to vector<128x128xf32>
    %c0_5 = arith.constant 0 : index
    %c0_6 = arith.constant 0 : index
    %6 = vector.load %arg4[%c0_5, %c0_6] : memref<128x128xf32, #tpu.memory_space<vmem>>, vector<128x128xf32>
    %cst = arith.constant dense<0.000000e+00> : vector<128x128xf32>
    %7 = tpu.matmul %5, %6, %cst {dimension_numbers = #tpu.dot_dimension_numbers<[1], [0], [0], [1], [0, 0, 1, 1], [], []>} : vector<128x128xf32>, vector<128x128xf32>, vector<128x128xf32> -> vector<128x128xf32>
    %8 = arith.addf %3, %7 : vector<128x128xf32>
    %c0_7 = arith.constant 0 : index
    %c0_8 = arith.constant 0 : index
    %9 = vector.load %arg7[%c0_7, %c0_8] : memref<128x128xf32, #tpu.memory_space<vmem>>, vector<128x128xf32>
    tpu.vector_store %arg7[%c0_7, %c0_8], %8 {strides = array<i32>} : memref<128x128xf32, #tpu.memory_space<vmem>>, vector<128x128xf32>,
    %c0_i32_9 = arith.constant 0 : i32
    %10 = arith.cmpi eq, %arg2, %c0_i32_9 : i32
    %11 = arith.extui %10 : i1 to i32
    %c0_i32_10 = arith.constant 0 : i32
    %12 = arith.cmpi ne, %11, %c0_i32_10 : i32
    scf.if %12 {
      %c0_11 = arith.constant 0 : index
      %c0_12 = arith.constant 0 : index
      %13 = vector.load %arg7[%c0_11, %c0_12] : memref<128x128xf32, #tpu.memory_space<vmem>>, vector<128x128xf32>
      %c0_13 = arith.constant 0 : index
      %c0_14 = arith.constant 0 : index
      %14 = vector.load %arg5[%c0_13, %c0_14] : memref<1x128xf32, #tpu.memory_space<vmem>>, vector<1x128xf32>
      %15 = vector.broadcast %14 : vector<1x128xf32> to vector<128x128xf32>
      %16 = arith.addf %13, %15 : vector<128x128xf32>
      %cst_15 = arith.constant 0.000000e+00 : f32
      %17 = vector.broadcast %cst_15 : f32 to vector<128x128xf32>
      %18 = arith.maximumf %16, %17 : vector<128x128xf32>
      %c0_16 = arith.constant 0 : index
      %c0_17 = arith.constant 0 : index
      %c0_18 = arith.constant 0 : index
      %19 = vector.load %arg6[%c0_16, %c0_17, %c0_18] : memref<1x128x128xf32, #tpu.memory_space<vmem>>, vector<1x128x128xf32>
      %20 = vector.shape_cast %19 : vector<1x128x128xf32> to vector<128x128xf32>
      %21 = vector.shape_cast %18 : vector<128x128xf32> to vector<1x128x128xf32>
      tpu.vector_store %arg6[%c0_16, %c0_17, %c0_18], %21 {strides = array<i32>} : memref<1x128x128xf32, #tpu.memory_space<vmem>>, vector<1x128x128xf32>,
    } else {
    }
    return
  }
  func.func @transform_0(%arg0: i32, %arg1: i32, %arg2: i32) -> (i32, i32, i32) {
    %c0_i32 = arith.constant 0 : i32
    return %arg0, %arg1, %arg2 : i32, i32, i32
  }
  func.func @transform_1(%arg0: i32, %arg1: i32, %arg2: i32) -> (i32, i32) {
    %c0_i32 = arith.constant 0 : i32
    %c0_i32_0 = arith.constant 0 : i32
    return %arg2, %c0_i32 : i32, i32
  }
  func.func @transform_2(%arg0: i32, %arg1: i32, %arg2: i32) -> (i32, i32) {
    %c0_i32 = arith.constant 0 : i32
    %c0_i32_0 = arith.constant 0 : i32
    %c0_i32_1 = arith.constant 0 : i32
    return %c0_i32, %c0_i32_0 : i32, i32
  }
  func.func @transform_3(%arg0: i32, %arg1: i32, %arg2: i32) -> (i32, i32, i32) {
    %c0_i32 = arith.constant 0 : i32
    %c0_i32_0 = arith.constant 0 : i32
    return %arg0, %arg1, %c0_i32 : i32, i32, i32
  }
}

</mosaic_0001>

<bundles_post_ra>
// kernel: tpu_custom_call.1
= control target key start
LH: loop header
LB: loop body
LE: loop exit
PB: predicated region body
PF: predicated region fallthrough
CT: control target
= control target key end

     0   :  { %s1415_s0 = inlined_call_operand.hbm [shape: f32[2,256,128], index: 0, kind: input, shape index: {}]   ;;  %s1416_s1 = inlined_call_operand.hbm [shape: f32[128,128], index: 1, kind: input, shape index: {}]   ;;  %s1417_s2 = inlined_call_operand.vmem [shape: f32[1,128], index: 2, kind: input, shape index: {}]   ;;  %s1418_s3 = inlined_call_operand.hbm [shape: f32[2,256,128], index: 3, kind: output, shape index: {}]  }
   0x1   :  { %1429 = sst [smem:[#allocation16_spill]] %s1416_s1 }
   0x2   :  { %8 = vsyncpa [#allocation4], 0 }
   0x3   :  { %10 = vsyncpa [#allocation4 + $0x1], 0 }
   0x4   :  { %11 = vsyncpa [#allocation7], 0 }
   0x5   :  { %12 = vsyncpa [#allocation5], 0 }
   0x6   :  { %14 = vsyncpa [#allocation5 + $0x1], 0  ;;  %s1122_s12 = smov 0   ;;  %s1124_s13 = smov 0  }
   0x7   :  { %s1126_s14 = smov 0   ;;  %s1128_s15 = smov 0  }
   0x8   :  { %s1130_s16 = smov 0   ;;  %s1132_s17 = smov 0  }
   0x9   :  { %s1134_s18 = smov 0   ;;  %s1136_s19 = smov 0  }
   0xa LB: > { %1430 = sst [smem:[#allocation12_spill]] %s1085_s17  ;;  %s684_s20 = sadd.s32 4294967295, %s1093_s19   ;;  %s1093_s19 = sphi %s1136_s19, %s20_s19   ;;  %s1089_s18 = sphi %s1134_s18, %s1459_s18   ;;  %s1085_s17 = sphi %s1132_s17, %s1453_s17   ;;  %s1081_s16 = sphi %s1130_s16, %s1458_s16   ;;  %s1077_s15 = sphi %s1128_s15, %s1452_s15   ;;  %s1073_s14 = sphi %s1126_s14, %s1457_s14   ;;  %s1069_s13 = sphi %s1124_s13, %s1456_s13   ;;  %s1065_s12 = sphi %s1122_s12, %s1455_s12  }
   0xb   : > { %s685_s21 = sadd.s32 4294967294, %s1093_s19   ;;  %p63_p0 = scmp.ne.s32.totalorder %s1069_s13, %s1065_s12 }
   0xc   : > { %p1166_p1 = scmp.eq.s32.totalorder %s684_s20, 0  ;;  %p1170_p2 = scmp.eq.s32.totalorder %s684_s20, 3 }
   0xd   : > { %p142_p3 = scmp.eq.s32.totalorder %s685_s21, 3  ;;  %p686_p5 = scmp.ge.s32.totalorder %s1093_s19, 1 }
   0xe   : > { %s1431_s22 = scalar_select %p1166_p1, 1, 0 }
   0xf   : > { %s1432_s23 = scalar_select %p1170_p2, 1, 0 }
  0x10   : > { %p1176_p4 = por %p1166_p1, %p63_p0  ;;  %p1181_p6 = por %p142_p3, %p63_p0 }
  0x11   : > { %p149_p7 = scmp.lt.s32.totalorder %s1093_s19, 5  ;;  %s1095_s27 = smov [#allocation6]  }
  0x12   : > { %s1433_s24 = scalar_select %p1176_p4, 1, 0 }
  0x13   : > { %s1434_s25 = scalar_select %p1181_p6, 1, 0 }
  0x14   : > { %p1186_p8 = pnand %p686_p5, %p149_p7  ;;  %s164_s28 = sshll.u32 %s1095_s27, 4  ;;  %s165_s28 = int_to_ptr.vmem [resolvable:$true] %s164_s28 }
  0x15   : > { %1435 = sst [smem:[#allocation13_spill]] %s1434_s25  ;;  %s1438_s1 = sld [smem:[#allocation16_spill]] }
  0x16   : > { %s1436_s26 = scalar_select %p1186_p8, 1, 0 }
  0x17   : > { %p848_p9 = pneg %p1186_p8 }
  0x19   : > { %p1194_p10 = pnand %p848_p9, %p1166_p1 }
  0x1b   : > { %s933_s5 = scalar_lea.hbm %s1438_s1, 2048  ;;  %p935_p12 = pneg %p1194_p10 }
  0x1c   : > { %p934_p11 = scmp.ne.s32.totalorder %s1438_s1, %s933_s5  ;;  %p940_p3 = scmp.lt.u32.totalorder %s933_s5, %s1438_s1 }
  0x1e   : > { %p936_p13 = pnand %p935_p12, %p934_p11 }
  0x20   : > { %p937_p0 = pneg %p936_p13 }
  0x22   : > { %p942_p5 = pnand %p940_p3, %p937_p0 }
  0x24   : > { %945 = shalt.err (!%p942_p5)
}
  0x25   : > { %s946_s10 = scalar_lea.vmem %s165_s28, 2048  ;;  %p954_p1 = scmp.lt.s32.totalorder %s165_s28, %s165_s28 }
  0x26   : > { %p947_p7 = scmp.ne.s32.totalorder %s165_s28, %s946_s10  ;;  %p955_p4 = scmp.lt.s32.totalorder %s946_s10, %s946_s10 }
  0x28   : > { %p949_p9 = pnand %p947_p7, %p935_p12  ;;  %p956_p8 = por %p955_p4, %p954_p1 }
  0x2a   : > { %p950_p6 = pneg %p949_p9 }
  0x2c   : > { %p957_p2 = pnand %p956_p8, %p950_p6 }
  0x2e   : > { %960 = shalt.err (!%p957_p2)
}
  0x2f   : > { %s1423_s11 = smov 128   ;;  %s1424_s20 = smov 8  }
  0x30   : > { %851 = dma.hbm_to_vmem [thread:$0]  (!%p1194_p10), %s1438_s1, 2048, %s165_s28, [#allocation7], %s1423_s11, %s1423_s11, %s1424_s20  }
  0x31   : > { %s35_s30 = sadd.s32 1, %s1085_s17  ;;  %s39_s4 = sadd.s32 1, %s1089_s18 }
  0x32   : > { %p37_p1 = scmp.ge.s32.totalorder %s35_s30, 2  ;;  %s50_s5 = sadd.s32 1, %s1073_s14 }
  0x33   : > { %p57_p2 = scmp.ne.s32.totalorder %s1073_s14, %s1069_s13  ;;  %p58_p4 = scmp.eq.s32.totalorder %s1093_s19, 0 }
  0x34   : > { %s1461_s30 = smov (%p37_p1, %s35_s30), 0  ;;  %s1463_s4 = smov (!%p37_p1, %s39_s4), %s1089_s18 }
  0x35   : > { %1439 = sst [smem:[#allocation14_spill]] %s1461_s30  ;;  %s44_s29 = ssub.s32 %s1085_s17, %s1461_s30 }
  0x36   : > { %p41_p6 = scmp.ge.s32.totalorder %s1463_s4, 2  ;;  %p1440_p8 = scmp.ne.s32.totalorder %s1432_s23, 0 }
  0x37   : > { %p1234_p10 = por %p58_p4, %p57_p2  ;;  %p861_p12 = scmp.lt.s32.totalorder %s1093_s19, 4 }
  0x38   : > { %p1230_p11 = por %p1440_p8, %p57_p2  ;;  %s1465_s4 = smov (%p41_p6, %s1463_s4), 0 }
  0x39   : > { %1443 = sst [smem:[#allocation15_spill]] %s1465_s4  ;;  %s181_s7 = sand.u32 1, %s1073_s14  }
  0x3a   : > { %s690_s8 = sshll.u32 %s1085_s17, 4  ;;  %s43_s9 = ssub.s32 %s1089_s18, %s1465_s4 }
  0x3b   : > { %s45_s10 = sor.u32 %s44_s29, %s43_s9  ;;  %s689_s21 = sshll.u32 %s181_s7, 7 }
  0x3c   : > { %p48_p13 = scmp.eq.s32.totalorder %s45_s10, 0  ;;  %s691_s23 = sshll.u32 %s1089_s18, 5 }
  0x3d   : > { %s185_s27 = scalar_lea.vmem [#allocation3], %s689_s21  ;;  %s192_s1 = sadd.s32 %s691_s23, %s690_s8 }
  0x3e   : > { %s195_s11 = sshll.u32 %s185_s27, 4  ;;  %s692_s30 = sshll.u32 %s192_s1, 7  ;;  %s1249_s11 = int_to_ptr.vmem [resolvable:$true] %s195_s11 }
  0x3f   : > { %s1247_s20 = scalar_select %p48_p13, %s1073_s14, %s50_s5  }
  0x40   : > { %p1255_p0 = pnand %p861_p12, %p1234_p10  ;;  %s1262_s29 = scalar_lea.hbm %s1415_s0, %s692_s30 }
  0x41   : > { %s1264_s5 = scalar_lea.sflag [#allocation4], %s181_s7  ;;  %s961_s1 = scalar_lea.hbm %s1262_s29, 2048 }
  0x42   : > { %p962_p3 = scmp.ne.s32.totalorder %s1262_s29, %s961_s1  ;;  %p963_p5 = pneg %p1255_p0 }
  0x43   : > { %s966_s4 = scalar_lea.hbm %s1415_s0, 8192  ;;  %p967_p1 = scmp.lt.u32.totalorder %s1262_s29, %s1415_s0 }
  0x44   : > { %p964_p7 = pnand %p963_p5, %p962_p3  ;;  %p968_p2 = scmp.lt.u32.totalorder %s966_s4, %s961_s1 }
  0x45   : > { %p970_p6 = scmp.lt.u32.totalorder %s961_s1, %s1262_s29 }
  0x46   : > { %p965_p9 = pneg %p964_p7  ;;  %p969_p4 = por %p968_p2, %p967_p1 }
  0x48   : > { %p971_p8 = por %p970_p6, %p969_p4 }
  0x4a   : > { %p972_p10 = pnand %p971_p8, %p965_p9 }
  0x4c   : > { %975 = shalt.err (!%p972_p10)
}
  0x4d   : > { %s976_s7 = scalar_lea.vmem %s1249_s11, 2048  ;;  %s1098_s9 = smov [#allocation3]  }
  0x4e   : > { %p977_p12 = scmp.ne.s32.totalorder %s1249_s11, %s976_s7  ;;  %s981_s10 = sshll.u32 %s1098_s9, 4  ;;  %s982_s10 = int_to_ptr.vmem [resolvable:$false] %s981_s10 }
  0x4f   : > { %s983_s21 = scalar_lea.vmem %s982_s10, 4096  ;;  %p984_p7 = scmp.lt.s32.totalorder %s1249_s11, %s982_s10 }
  0x50   : > { %p979_p13 = pnand %p977_p12, %p963_p5  ;;  %p985_p1 = scmp.lt.s32.totalorder %s983_s21, %s976_s7 }
  0x52   : > { %p980_p3 = pneg %p979_p13  ;;  %p986_p2 = por %p985_p1, %p984_p7 }
  0x54   : > { %p987_p4 = pnand %p986_p2, %p980_p3 }
  0x56   : > { %990 = shalt.err (!%p987_p4)
}
  0x57   : > { %s1445_s23 = smov 8   ;;  %s1446_s27 = smov 128  }
  0x58   : > { %855 = dma.hbm_to_vmem [thread:$0]  (!%p1255_p0), %s1262_s29, 2048, %s1249_s11, %s1264_s5, %s1446_s27, %s1446_s27, %s1445_s23  }
  0x59   : > { %p1447_p5 = scmp.ne.s32.totalorder %s1436_s26, 0 }
  0x5a   : > { %s1298_s1 = sand.u32 (!%p1447_p5), 1, %s1069_s13   ;;  %p1448_p9 = scmp.ne.s32.totalorder (!%p1447_p5), %s1433_s24, 0 }
  0x5b   : > { %207 = sbr.rel (%p1447_p5) target bundleno = 381 (0x17d), region = 32  ;;  %s694_s28 = sshll.u32 (!%p1447_p5), %s1298_s1, 7 }
  0x5c   : > { %s210_s17 = scalar_lea.sflag (!%p1447_p5), [#allocation4], %s1298_s1  ;;  %s1304_s25 = scalar_lea.vmem (!%p1447_p5), [#allocation3], %s694_s28 }
  0x62   : > { %1052 = dma.done.wait (%p1448_p9), %s210_s17, 2048  }
  0x63   : > { %1054 = vsyncadd (%p1448_p9), %s210_s17, 4294965248  ;;  %p1449_p0 = scmp.ne.s32.totalorder %s1431_s22, 0 }
  0x65   : > { %1056 = dma.done.wait (%p1449_p0), [#allocation7], 2048  }
  0x66   : > { %1058 = vsyncadd (%p1449_p0), [#allocation7], 4294965248  ;;  %v295_v0 = vld [vmem:[#allocation6] sm:$0xff]  ;;  %v296_v1 = vld [vmem:[#allocation6 + $0x8] sm:$0xff]  ;;  %s1335_s26 = scalar_lea.vmem [#allocation8], %s694_s28  ;;  %s699_s11 = sshll.u32 %s1077_s15, 4 }
  0x67   : > { %v297_v2 = vld [vmem:[#allocation6 + $0x10] sm:$0xff]  ;;  %v792_v3 = vpack.c.bf16 %v296_v1, %v295_v0  ;;  %v298_v4 = vld [vmem:[#allocation6 + $0x18] sm:$0xff]  ;;  %v299_v6 = vld [vmem:[#allocation6 + $0x20] sm:$0xff]  ;;  %s700_s29 = sshll.u32 %s1081_s16, 5  ;;  %s578_s16 = sshll.u32 %s1335_s26, 4  ;;  %s1357_s16 = int_to_ptr.vmem [resolvable:$true] %s578_s16 }
  0x68   : > { %v796_v5 = vpack.c.bf16 %v298_v4, %v297_v2  ;;  %v300_v7 = vld [vmem:[#allocation6 + $0x28] sm:$0xff]  ;;  %v279_v9 = vld [vmem:[%s1304_s25] sm:$0xff]  ;;  %v301_v11 = vld [vmem:[#allocation6 + $0x30] sm:$0xff]  ;;  %s575_s5 = sadd.s32 %s700_s29, %s699_s11  ;;  %s563_s7 = scalar_lea.sflag [#allocation5], %s1298_s1 }
  0x69   : > { %793 = vmatprep.subr.bf16.mxu0 %v792_v3  ;;  %824 = vmatprep.subr.bf16.mxu1 %v792_v3  ;;  %v800_v8 = vpack.c.bf16 %v300_v7, %v299_v6  ;;  %v287_v10 = vld [vmem:[%s1304_s25 + $0x40] sm:$0xff]  ;;  %v302_v12 = vld [vmem:[#allocation6 + $0x38] sm:$0xff]  ;;  %v304_v15 = vld [vmem:[#allocation6 + $0x48] sm:$0xff]  ;;  %s701_s15 = sshll.u32 %s575_s5, 7  ;;  %s991_s9 = scalar_lea.vmem %s1357_s16, 2048 }
  0x6a   : > { %795 = vmatpush3.bf16.msra.mxu0 %v792_v3  ;;  %832 = vmatpush3.bf16.msra.mxu1 %v792_v3  ;;  %v804_v13 = vpack.c.bf16 %v302_v12, %v301_v11  ;;  %v303_v14 = vld [vmem:[#allocation6 + $0x40] sm:$0xff]  ;;  %v305_v17 = vld [vmem:[#allocation6 + $0x50] sm:$0xff]  ;;  %v306_v18 = vld [vmem:[#allocation6 + $0x58] sm:$0xff]  ;;  %s1355_s8 = scalar_lea.hbm %s1418_s3, %s701_s15  ;;  %p992_p6 = scmp.ne.s32.totalorder %s1357_s16, %s991_s9 }
  0x6b   : > { %797 = vmatprep.subr.bf16.mxu0 %v796_v5  ;;  %825 = vmatprep.subr.bf16.mxu1 %v796_v5  ;;  %v808_v16 = vpack.c.bf16 %v304_v15, %v303_v14  ;;  %v812_v19 = vpack.c.bf16 %v306_v18, %v305_v17  ;;  %v307_v20 = vld [vmem:[#allocation6 + $0x60] sm:$0xff]  ;;  %v308_v21 = vld [vmem:[#allocation6 + $0x68] sm:$0xff]  ;;  %v309_v23 = vld [vmem:[#allocation6 + $0x70] sm:$0xff]  ;;  %s1099_s10 = smov [#allocation8]  }
  0x6c   : > { %768 = vmatprep.mubr.f32.mxu0 %v279_v9  ;;  %780 = vmatprep.mubr.f32.mxu1 %v287_v10  ;;  %v816_v22 = vpack.c.bf16 %v308_v21, %v307_v20  ;;  %v310_v24 = vld [vmem:[#allocation6 + $0x78] sm:$0xff]  ;;  %v280_v26 = vld [vmem:[%s1304_s25 + $0x8] sm:$0xff]  ;;  %v281_v28 = vld [vmem:[%s1304_s25 + $0x10] sm:$0xff]  ;;  %p993_p8 = pnand %p992_p6, %p1230_p11  ;;  %s995_s21 = sshll.u32 %s1099_s10, 4  ;;  %s996_s21 = int_to_ptr.vmem [resolvable:$false] %s995_s21 }
  0x6d   : > { %v820_v25 = vpack.c.bf16 %v310_v24, %v309_v23  ;;  %v288_v27 = vld [vmem:[%s1304_s25 + $0x48] sm:$0xff]  ;;  %v289_v29 = vld [vmem:[%s1304_s25 + $0x50] sm:$0xff]  ;;  %v282_v30 = vld [vmem:[%s1304_s25 + $0x18] sm:$0xff]  ;;  %s997_s23 = scalar_lea.vmem %s996_s21, 4096  ;;  %p998_p12 = scmp.lt.s32.totalorder %s1357_s16, %s996_s21 }
  0x6e   : > { %799 = vmatpush3.bf16.msra.mxu0 %v796_v5  ;;  %833 = vmatpush3.bf16.msra.mxu1 %v796_v5  ;;  %v290_v31 = vld [vmem:[%s1304_s25 + $0x58] sm:$0xff]  ;;  %v283_v32 = vld [vmem:[%s1304_s25 + $0x20] sm:$0xff]  ;;  %v284_v34 = vld [vmem:[%s1304_s25 + $0x28] sm:$0xff]  ;;  %p994_p10 = pneg %p993_p8  ;;  %p999_p13 = scmp.lt.s32.totalorder %s997_s23, %s991_s9 }
  0x6f   : > { %801 = vmatprep.subr.bf16.mxu0 %v800_v8  ;;  %826 = vmatprep.subr.bf16.mxu1 %v800_v8  ;;  %v291_v33 = vld [vmem:[%s1304_s25 + $0x60] sm:$0xff]  ;;  %v292_v35 = vld [vmem:[%s1304_s25 + $0x68] sm:$0xff]  ;;  %v285_v36 = vld [vmem:[%s1304_s25 + $0x30] sm:$0xff] }
  0x70   : > { %v293_v37 = vld [vmem:[%s1304_s25 + $0x70] sm:$0xff]  ;;  %v286_v38 = vld [vmem:[%s1304_s25 + $0x38] sm:$0xff]  ;;  %v697_v40 = vld [vmem:[%s1417_s2] ss:$0 sm:$0xff]  ;;  %p1000_p3 = por %p999_p13, %p998_p12 }
  0x71   : > { %v294_v39 = vld [vmem:[%s1304_s25 + $0x78] sm:$0xff] }
  0x72   : > { %803 = vmatpush3.bf16.msra.mxu0 %v800_v8  ;;  %834 = vmatpush3.bf16.msra.mxu1 %v800_v8  ;;  %p1001_p7 = pnand %p1000_p3, %p994_p10 }
  0x73   : > { %805 = vmatprep.subr.bf16.mxu0 %v804_v13  ;;  %827 = vmatprep.subr.bf16.mxu1 %v804_v13 }
  0x76   : > { %807 = vmatpush3.bf16.msra.mxu0 %v804_v13  ;;  %835 = vmatpush3.bf16.msra.mxu1 %v804_v13 }
  0x77   : > { %809 = vmatprep.subr.bf16.mxu0 %v808_v16  ;;  %828 = vmatprep.subr.bf16.mxu1 %v808_v16 }
  0x7a   : > { %811 = vmatpush3.bf16.msra.mxu0 %v808_v16  ;;  %836 = vmatpush3.bf16.msra.mxu1 %v808_v16 }
  0x7b   : > { %813 = vmatprep.subr.bf16.mxu0 %v812_v19  ;;  %829 = vmatprep.subr.bf16.mxu1 %v812_v19 }
  0x7e   : > { %815 = vmatpush3.bf16.msra.mxu0 %v812_v19  ;;  %837 = vmatpush3.bf16.msra.mxu1 %v812_v19 }
  0x7f   : > { %817 = vmatprep.subr.bf16.mxu0 %v816_v22  ;;  %830 = vmatprep.subr.bf16.mxu1 %v816_v22 }
  0x82   : > { %819 = vmatpush3.bf16.msra.mxu0 %v816_v22  ;;  %838 = vmatpush3.bf16.msra.mxu1 %v816_v22 }
  0x83   : > { %821 = vmatprep.subr.bf16.mxu0 %v820_v25  ;;  %831 = vmatprep.subr.bf16.mxu1 %v820_v25 }
  0x86   : > { %823 = vmatpush3.bf16.msra.mxu0 %v820_v25  ;;  %839 = vmatpush3.bf16.msra.mxu1 %v820_v25 }
  0x89   : > { %769 = vmatmul.mubr.f32.vlgmr.msra.gmra.mrb[0].mxu0 %v280_v26  ;;  %781 = vmatmul.mubr.f32.vlgmr.msra.gmra.mrb[0].mxu1 %v288_v27 }
  0x8a   : > { %771 = vmatprep.mubr.f32.mxu0 %v281_v28  ;;  %783 = vmatprep.mubr.f32.mxu1 %v289_v29 }
  0x8d   : > { %772 = vmatmul.mubr.f32.gmra.mrb[2].mxu0 %v282_v30  ;;  %784 = vmatmul.mubr.f32.gmra.mrb[2].mxu1 %v290_v31 }
  0x8e   : > { %774 = vmatprep.mubr.f32.mxu0 %v283_v32  ;;  %786 = vmatprep.mubr.f32.mxu1 %v291_v33 }
  0x91   : > { %775 = vmatmul.mubr.f32.gmra.mrb[4].mxu0 %v284_v34  ;;  %787 = vmatmul.mubr.f32.gmra.mrb[4].mxu1 %v292_v35 }
  0x92   : > { %777 = vmatprep.mubr.f32.mxu0 %v285_v36  ;;  %789 = vmatprep.mubr.f32.mxu1 %v293_v37 }
  0x95   : > { %778 = vmatmul.mubr.f32.gmra.mrb[6].mxu0 %v286_v38  ;;  %790 = vmatmul.mubr.f32.gmra.mrb[6].mxu1 %v294_v39 }
 0x15c   : > { %v770_v41 = vpop.f32.mrb[0].mxu0  ;;  %v782_v42 = vpop.f32.mrb[0].mxu1 }
 0x15d   : > { %v515_v43 = vadd.f32 %v770_v41, %v697_v40  ;;  %v523_v44 = vadd.f32 %v782_v42, %v697_v40  ;;  %v377_v45 = vpop.f32.mrb[1].mxu0  ;;  %v417_v46 = vpop.f32.mrb[1].mxu1 }
 0x15e   : > { %v514_v47 = vadd.f32 %v697_v40, %v377_v45  ;;  %v522_v48 = vadd.f32 %v697_v40, %v417_v46 }
 0x15f   : > { %v531_v49 = vmax.f32 %v515_v43, 0.0  ;;  %v539_v50 = vmax.f32 %v523_v44, 0.0 }
 0x160   : > { %v530_v51 = vmax.f32 %v514_v47, 0.0  ;;  %v538_v52 = vmax.f32 %v522_v48, 0.0  ;;  %v773_v53 = vpop.f32.mrb[2].mxu0  ;;  %v785_v54 = vpop.f32.mrb[2].mxu1 }
 0x161   : > { %547 = vst [vmem:[%s1335_s26 + $0x8] sm:$0xff] %v531_v49  ;;  %555 = vst [vmem:[%s1335_s26 + $0x48] sm:$0xff] %v539_v50  ;;  %v517_v55 = vadd.f32 %v773_v53, %v697_v40  ;;  %v525_v56 = vadd.f32 %v785_v54, %v697_v40  ;;  %v387_v57 = vpop.f32.mrb[3].mxu0  ;;  %v427_v58 = vpop.f32.mrb[3].mxu1 }
 0x162   : > { %546 = vst [vmem:[%s1335_s26] sm:$0xff] %v530_v51  ;;  %554 = vst [vmem:[%s1335_s26 + $0x40] sm:$0xff] %v538_v52  ;;  %v516_v59 = vadd.f32 %v697_v40, %v387_v57  ;;  %v524_v60 = vadd.f32 %v697_v40, %v427_v58 }
 0x163   : > { %v533_v61 = vmax.f32 %v517_v55, 0.0  ;;  %v541_v62 = vmax.f32 %v525_v56, 0.0 }
 0x164   : > { %v532_v63 = vmax.f32 %v516_v59, 0.0  ;;  %v540_v0 = vmax.f32 %v524_v60, 0.0  ;;  %v776_v1 = vpop.f32.mrb[4].mxu0  ;;  %v788_v2 = vpop.f32.mrb[4].mxu1 }
 0x165   : > { %549 = vst [vmem:[%s1335_s26 + $0x18] sm:$0xff] %v533_v61  ;;  %557 = vst [vmem:[%s1335_s26 + $0x58] sm:$0xff] %v541_v62  ;;  %v519_v3 = vadd.f32 %v776_v1, %v697_v40  ;;  %v527_v4 = vadd.f32 %v788_v2, %v697_v40  ;;  %v397_v5 = vpop.f32.mrb[5].mxu0  ;;  %v437_v6 = vpop.f32.mrb[5].mxu1 }
 0x166   : > { %548 = vst [vmem:[%s1335_s26 + $0x10] sm:$0xff] %v532_v63  ;;  %556 = vst [vmem:[%s1335_s26 + $0x50] sm:$0xff] %v540_v0  ;;  %v518_v7 = vadd.f32 %v697_v40, %v397_v5  ;;  %v526_v8 = vadd.f32 %v697_v40, %v437_v6 }
 0x167   : > { %v535_v9 = vmax.f32 %v519_v3, 0.0  ;;  %v543_v10 = vmax.f32 %v527_v4, 0.0 }
 0x168   : > { %v534_v11 = vmax.f32 %v518_v7, 0.0  ;;  %v542_v12 = vmax.f32 %v526_v8, 0.0  ;;  %v779_v13 = vpop.f32.mrb[6].mxu0  ;;  %v791_v14 = vpop.f32.mrb[6].mxu1 }
 0x169   : > { %551 = vst [vmem:[%s1335_s26 + $0x28] sm:$0xff] %v535_v9  ;;  %559 = vst [vmem:[%s1335_s26 + $0x68] sm:$0xff] %v543_v10  ;;  %v521_v15 = vadd.f32 %v779_v13, %v697_v40  ;;  %v529_v16 = vadd.f32 %v791_v14, %v697_v40  ;;  %v407_v17 = vpop.f32.mrb[7].mxu0  ;;  %v447_v18 = vpop.f32.mrb[7].mxu1 }
 0x16a   : > { %550 = vst [vmem:[%s1335_s26 + $0x20] sm:$0xff] %v534_v11  ;;  %558 = vst [vmem:[%s1335_s26 + $0x60] sm:$0xff] %v542_v12  ;;  %v520_v19 = vadd.f32 %v697_v40, %v407_v17  ;;  %v528_v20 = vadd.f32 %v697_v40, %v447_v18 }
 0x16b   : > { %v537_v21 = vmax.f32 %v521_v15, 0.0  ;;  %v545_v22 = vmax.f32 %v529_v16, 0.0 }
 0x16c   : > { %v536_v23 = vmax.f32 %v520_v19, 0.0  ;;  %v544_v24 = vmax.f32 %v528_v20, 0.0 }
 0x16d   : > { %553 = vst [vmem:[%s1335_s26 + $0x38] sm:$0xff] %v537_v21  ;;  %561 = vst [vmem:[%s1335_s26 + $0x78] sm:$0xff] %v545_v22 }
 0x16e   : > { %552 = vst [vmem:[%s1335_s26 + $0x30] sm:$0xff] %v536_v23  ;;  %560 = vst [vmem:[%s1335_s26 + $0x70] sm:$0xff] %v544_v24 }
 0x16f   : > { %1004 = shalt.err (!%p1001_p7)
}
 0x170   : > { %s1005_s27 = scalar_lea.hbm %s1355_s8, 2048  ;;  %s1009_s25 = scalar_lea.hbm %s1418_s3, 8192 }
 0x171   : > { %p1006_p1 = scmp.ne.s32.totalorder %s1355_s8, %s1005_s27  ;;  %p1010_p5 = scmp.lt.u32.totalorder %s1355_s8, %s1418_s3 }
 0x172   : > { %p1011_p9 = scmp.lt.u32.totalorder %s1009_s25, %s1005_s27  ;;  %p1013_p6 = scmp.lt.u32.totalorder %s1005_s27, %s1355_s8 }
 0x173   : > { %p1007_p2 = pnand %p1006_p1, %p1230_p11 }
 0x174   : > { %p1012_p0 = por %p1011_p9, %p1010_p5 }
 0x175   : > { %p1008_p4 = pneg %p1007_p2 }
 0x176   : > { %p1014_p8 = por %p1013_p6, %p1012_p0 }
 0x178   : > { %p1015_p10 = pnand %p1014_p8, %p1008_p4 }
 0x17a   : > { %1018 = shalt.err (!%p1015_p10)
}
 0x17b   : > { %s1100_s26 = smov 128   ;;  %s1101_s11 = smov 8  }
 0x17c   : > { %846 = dma.vmem_to_hbm [thread:$0]  (%p1230_p11), %s1357_s16, 2048, %s1355_s8, %s563_s7, %s1100_s26, %s1100_s26, %s1101_s11  }
 0x17d PF: > { %s1450_s29 = sld [smem:[#allocation13_spill]]  ;;  %p863_p12 = scmp.ge.s32.totalorder %s1093_s19, 2 }
 0x17e   : > { %s593_s5 = sand.u32 1, %s1065_s12  }
 0x17f   : > { %s594_s15 = scalar_lea.sflag [#allocation5], %s593_s5 }
 0x183   : > { %p1451_p13 = scmp.ne.s32.totalorder %s1450_s29, 0 }
 0x185   : > { %p857_p3 = pnand %p863_p12, %p1451_p13 }
 0x187   : > { %1060 = dma.done.wait (!%p857_p3), %s594_s15, 2048  }
 0x188   : > { %1062 = vsyncadd (!%p857_p3), %s594_s15, 4294965248  ;;  %s20_s19 = sadd.s32 1, %s1093_s19   ;;  %s1452_s15 = sld [smem:[#allocation12_spill]] }
 0x189   : > { %p17_p7 = scmp.ge.s32.totalorder %s20_s19, 6   ;;  %s1453_s17 = sld [smem:[#allocation14_spill]] }
 0x18a   : > { %s1454_s6 = sld [smem:[#allocation15_spill]]  ;;  %s1455_s12 = smov %s1069_s13 }
 0x18b   : > { %s1456_s13 = smov %s1073_s14  ;;  %s1457_s14 = smov %s1247_s20 }
 0x18c   : > { %s1458_s16 = smov %s1089_s18  ;;  %19 = sbr.rel (!%p17_p7) target bundleno = 10 (0xa), region = 90 }
 0x190   : > { %s1459_s18 = smov %s1454_s6 }
 0x193   :  { %599 = vsyncpa [#allocation4], 1 }
 0x194   :  { %601 = vsyncpa [#allocation4 + $0x1], 1 }
 0x195   :  { %602 = vsyncpa [#allocation7], 1 }
 0x196   :  { %603 = vsyncpa [#allocation5], 1 }
 0x197   :  { %605 = vsyncpa [#allocation5 + $0x1], 1 }

</bundles_post_ra>
